<compile_context>
chip_gen: v7x
topology: tpu7x:2x2x1
jax: 0.10.0
libtpu: 0.0.40
codegen_flags: <defaults>
</compile_context>

<pallas_src>
import jax
import jax.numpy as jnp
from jax.experimental import pallas as pl
from jax.experimental.pallas import tpu as pltpu


# ------------------------------- helpers -------------------------------------
_LANE = 128
_TM_MAX = 1024                 # row-tile cap
_TK_MAX = 4096                 # contraction (node) tile cap
_VMEM_LIMIT = 32 * 1024 * 1024  # legal on v5e/v6e/v7x, covers ~12 MiB usage


def _round_up(x, m):
    return ((x + m - 1) // m) * m


def _largest_dividing_tile(n_pad, cap):
    """Largest multiple of _LANE that divides n_pad and is <= cap (>= _LANE)."""
    t = max(_LANE, (cap // _LANE) * _LANE)
    while n_pad % t != 0:
        t -= _LANE
    return t


def _choose_tiling(n):
    """Padded node count + (tm, tk) tiles such that tm | n_pad and tk | n_pad."""
    n_pad = _round_up(n, _LANE)
    if n_pad <= _TK_MAX:
        tk = n_pad
        # Prefer >= 2 row tiles so the "parallel" axis can shard across cores.
        tm_cap = n_pad if n_pad < 2 * _LANE else n_pad // 2
        tm = _largest_dividing_tile(n_pad, min(_TM_MAX, tm_cap))
        return n_pad, tm, tk
    # Large graphs: pad to a multiple of 1024 so tm=1024 always divides, and
    # pick the biggest power-of-two tk <= 4096 that divides n_pad.
    n_pad = _round_up(n, _TM_MAX)
    m = n_pad // _TM_MAX
    if m % 4 == 0:
        tk = 4 * _TM_MAX
    elif m % 2 == 0:
        tk = 2 * _TM_MAX
    else:
        tk = _TM_MAX
    return n_pad, _TM_MAX, tk


def _pad_2d(a, rows, cols):
    return jnp.pad(a, ((0, rows - a.shape[0]), (0, cols - a.shape[1])))


# ----------------------------- Pallas kernel ---------------------------------
def sage_layer_kernel(a_ref, xs_ref, xr_ref, inv_ref, wl_ref, wr_ref, b_ref,
                      o_ref, acc_ref):
    """One SAGEConv row tile: accumulate A_count@X over k; scale + transform last."""
    k = pl.program_id(1)

    @pl.when(k == 0)
    def _init():
        acc_ref[...] = jnp.zeros_like(acc_ref)

    # int8 neighbor counts -> bf16 on the VPU (hidden under the A-tile DMA),
    # then aggregate on the narrow F_in axis (aggregate-first keeps both the
    # n x n contraction and the xs stream at width F_in).
    a_bf16 = a_ref[...].astype(jnp.bfloat16)
    acc_ref[...] += jnp.dot(a_bf16, xs_ref[...],
                            preferred_element_type=jnp.float32)

    @pl.when(k == pl.num_programs(1) - 1)
    def _finalize():
        # Exact f32 1/deg row scaling (mean aggregation), then the two dense
        # transforms + bias.
        agg = (acc_ref[...] * inv_ref[...]).astype(wl_ref.dtype)
        out = jnp.dot(agg, wl_ref[...], preferred_element_type=jnp.float32)
        out = out + jnp.dot(xr_ref[...], wr_ref[...],
                            preferred_element_type=jnp.float32)
        o_ref[...] = (out + b_ref[...]).astype(o_ref.dtype)


def sage_conv_pallas(a_counts, inv_deg, x, w_l, w_r, b2d, *,
                     out_dtype=jnp.bfloat16):
    """One SAGEConv layer: diag(inv_deg) @ (A_count @ x) @ w_l + x @ w_r + b.

    a_counts: [n_pad, n_pad] int8 edge-multiplicity matrix (padded).
    inv_deg:  [n_pad, 1]     f32 1/in-degree (0 for isolated / padded rows).
    x:        [n_pad, f_in]  bf16 node features (padded).
    w_l/w_r:  [f_in, f_pad]  bf16 weights, f_pad a multiple of 128.
    b2d:      [1, f_pad]     f32 bias.
    """
    n_pad = a_counts.shape[0]
    f_in = x.shape[1]
    f_pad = w_l.shape[1]
    _, tm, tk = _choose_tiling(n_pad)
    grid = (n_pad // tm, n_pad // tk)

    bf16 = 2
    flops = 2 * n_pad * n_pad * f_in + 2 * 2 * n_pad * f_in * f_pad
    bytes_accessed = (
        n_pad * n_pad                              # int8 A stream (dominant)
        + (n_pad // tm) * n_pad * f_in * bf16      # xs re-read once per row tile
        + n_pad * f_in * bf16                      # xr (root rows)
        + n_pad * 4                                # inv_deg
        + (w_l.size + w_r.size) * bf16             # weights (resident)
        + b2d.size * 4                             # bias
        + n_pad * f_pad * jnp.dtype(out_dtype).itemsize)

    return pl.pallas_call(
        sage_layer_kernel,
        out_shape=jax.ShapeDtypeStruct((n_pad, f_pad), out_dtype),
        grid_spec=pltpu.PrefetchScalarGridSpec(
            num_scalar_prefetch=0,
            grid=grid,
            in_specs=[
                pl.BlockSpec((tm, tk), lambda i, k: (i, k)),       # A counts tile
                pl.BlockSpec((tk, f_in), lambda i, k: (k, 0)),     # X rows (aggregation)
                pl.BlockSpec((tm, f_in), lambda i, k: (i, 0)),     # X rows (root term)
                pl.BlockSpec((tm, 1), lambda i, k: (i, 0)),        # 1/deg rows
                pl.BlockSpec((f_in, f_pad), lambda i, k: (0, 0)),  # W_l (resident)
                pl.BlockSpec((f_in, f_pad), lambda i, k: (0, 0)),  # W_r (resident)
                pl.BlockSpec((1, f_pad), lambda i, k: (0, 0)),     # bias
            ],
            out_specs=pl.BlockSpec((tm, f_pad), lambda i, k: (i, 0)),
            scratch_shapes=[pltpu.VMEM((tm, f_in), jnp.float32)],  # agg accumulator
        ),
        compiler_params=pltpu.CompilerParams(
            dimension_semantics=("parallel", "arbitrary"),
            vmem_limit_bytes=_VMEM_LIMIT),
        cost_estimate=pl.CostEstimate(
            flops=int(flops), transcendentals=0,
            bytes_accessed=int(bytes_accessed)),
    )(a_counts, x, x, inv_deg, w_l, w_r, b2d)


# ------------------------------ JAX glue --------------------------------------
def count_adjacency(edge_index, num_nodes):
    """Dense edge-count matrix + f32 inverse in-degree (matches PyG scatter-mean)."""
    src, dst = edge_index[0], edge_index[1]
    counts = jnp.zeros((num_nodes, num_nodes), jnp.float32).at[dst, src].add(1.0)
    deg = counts.sum(axis=1)
    inv_deg = jnp.where(deg > 0, 1.0 / deg, 0.0)
    return counts, inv_deg


def glorot(key, shape):
    fan_in, fan_out = shape
    limit = jnp.sqrt(6.0 / (fan_in + fan_out))
    return jax.random.uniform(key, shape, jnp.float32, -limit, limit)


def init_graphsage_params(key, node_in_dim, node_out_dim):
    k1, k2, k3, k4 = jax.random.split(key, 4)
    return {
        "w1_l": glorot(k1, (node_in_dim, node_out_dim)),
        "w1_r": glorot(k2, (node_in_dim, node_out_dim)),
        "b1": jnp.zeros((node_out_dim,), jnp.float32),
        "w2_l": glorot(k3, (node_out_dim, node_out_dim)),
        "w2_r": glorot(k4, (node_out_dim, node_out_dim)),
        "b2": jnp.zeros((node_out_dim,), jnp.float32),
    }


@jax.jit
def graphsage_forward(params, x, edge_index):
    """GraphSAGE.forward: conv1 then conv2 (no activation, per the module)."""
    n, f_in = x.shape
    f_out = params["w1_l"].shape[1]
    n_pad, _, _ = _choose_tiling(n)
    f_pad = _round_up(f_out, _LANE)

    # Shared aggregation structure: int8 counts (exact; assumes per-pair edge
    # multiplicity < 128) + f32 1/deg, zero-padded rows/cols.
    counts, inv_deg = count_adjacency(edge_index, n)
    a_i8 = _pad_2d(counts, n_pad, n_pad).astype(jnp.int8)
    inv_deg = _pad_2d(inv_deg.reshape(-1, 1), n_pad, 1).astype(jnp.float32)

    xp = jnp.pad(x, ((0, n_pad - n), (0, 0))).astype(jnp.bfloat16)

    # Layer 1 (F_in -> lane-padded F_out), bf16 intermediate.
    w1_l = _pad_2d(params["w1_l"], f_in, f_pad).astype(jnp.bfloat16)
    w1_r = _pad_2d(params["w1_r"], f_in, f_pad).astype(jnp.bfloat16)
    b1 = _pad_2d(params["b1"].reshape(1, -1), 1, f_pad).astype(jnp.float32)
    h = sage_conv_pallas(a_i8, inv_deg, xp, w1_l, w1_r, b1,
                         out_dtype=jnp.bfloat16)

    # Layer 2 (f_pad -> f_pad), bf16 writeback (half the bytes), cast outside.
    w2_l = _pad_2d(params["w2_l"], f_pad, f_pad).astype(jnp.bfloat16)
    w2_r = _pad_2d(params["w2_r"], f_pad, f_pad).astype(jnp.bfloat16)
    b2 = _pad_2d(params["b2"].reshape(1, -1), 1, f_pad).astype(jnp.float32)
    h = sage_conv_pallas(a_i8, inv_deg, h, w2_l, w2_r, b2,
                         out_dtype=jnp.bfloat16)

    return h[:n, :f_out].astype(jnp.float32)


# Pure-JAX f32 reference (PyG SAGEConv mean semantics) for correctness check.
def graphsage_forward_ref(params, x, edge_index):
    n = x.shape[0]
    counts, inv_deg = count_adjacency(edge_index, n)
    a = counts * inv_deg[:, None]
    h = (a @ x) @ params["w1_l"] + x @ params["w1_r"] + params["b1"]
    h = (a @ h) @ params["w2_l"] + h @ params["w2_r"] + params["b2"]
    return h


if __name__ == "__main__":
    key = jax.random.PRNGKey(0)
    k_feat, k_edge, k_param = jax.random.split(key, 3)

    num_nodes = 16
    node_in_dim = 8
    node_out_dim = 64
    num_edges = 24

    x = jax.random.normal(k_feat, (num_nodes, node_in_dim), jnp.float32)
    edge_index = jax.random.randint(
        k_edge, (2, num_edges), 0, num_nodes, dtype=jnp.int32
    )

    params = init_graphsage_params(k_param, node_in_dim, node_out_dim)

    out = graphsage_forward(params, x, edge_index)
    out = jax.block_until_ready(out)

    ref = graphsage_forward_ref(params, x, edge_index)
    assert out.shape == (num_nodes, node_out_dim)
    # bf16 MXU inputs + bf16 intermediate/output -> loose tolerance vs f32 ref
    # (the int8 counts + f32 inv-deg path keeps the aggregation weights exact).
    assert jnp.allclose(out, ref, atol=5e-2, rtol=5e-2), (
        float(jnp.max(jnp.abs(out - ref))))

    print("KERNEL_OK")
</pallas_src>

<mosaic_0001>
module attributes {stable_mosaic.version = 11 : i64} {
  func.func @sage_layer_kernel(%arg0: i32, %arg1: i32, %arg2: memref<128x128xi8, #tpu.memory_space<vmem>>, %arg3: memref<128x128xbf16, #tpu.memory_space<vmem>>, %arg4: memref<128x128xbf16, #tpu.memory_space<vmem>>, %arg5: memref<128x1xf32, #tpu.memory_space<vmem>>, %arg6: memref<128x128xbf16, #tpu.memory_space<vmem>>, %arg7: memref<128x128xbf16, #tpu.memory_space<vmem>>, %arg8: memref<1x128xf32, #tpu.memory_space<vmem>>, %arg9: memref<128x128xbf16, #tpu.memory_space<vmem>>, %arg10: memref<128x128xf32, #tpu.memory_space<vmem>>) attributes {dimension_semantics = [#tpu.dimension_semantics<parallel>, #tpu.dimension_semantics<arbitrary>], iteration_bounds = array<i64: 1, 1>, scalar_prefetch = 0 : i64, scratch_operands = 1 : i64, tpu.core_type = #tpu.core_type<tc>, window_params = [{transform_indices = @transform_0, window_bounds = array<i64: 128, 128>}, {transform_indices = @transform_1, window_bounds = array<i64: 128, 128>}, {transform_indices = @transform_2, window_bounds = array<i64: 128, 128>}, {transform_indices = @transform_3, window_bounds = array<i64: 128, 1>}, {pipeline_mode = #tpu.pipeline_mode<synchronous>, transform_indices = @transform_4, window_bounds = array<i64: 128, 128>}, {pipeline_mode = #tpu.pipeline_mode<synchronous>, transform_indices = @transform_5, window_bounds = array<i64: 128, 128>}, {pipeline_mode = #tpu.pipeline_mode<synchronous>, transform_indices = @transform_6, window_bounds = array<i64: 1, 128>}, {transform_indices = @transform_7, window_bounds = array<i64: 128, 128>}]} {
    %c0_i32 = arith.constant 0 : i32
    %0 = arith.cmpi eq, %arg1, %c0_i32 : i32
    %1 = arith.extui %0 : i1 to i32
    %c0_i32_0 = arith.constant 0 : i32
    %2 = arith.cmpi ne, %1, %c0_i32_0 : i32
    scf.if %2 {
      %cst_10 = arith.constant 0.000000e+00 : f32
      %13 = vector.broadcast %cst_10 : f32 to vector<128x128xf32>
      %c0_11 = arith.constant 0 : index
      %c0_12 = arith.constant 0 : index
      %14 = vector.load %arg10[%c0_11, %c0_12] : memref<128x128xf32, #tpu.memory_space<vmem>>, vector<128x128xf32>
      tpu.vector_store %arg10[%c0_11, %c0_12], %13 {strides = array<i32>} : memref<128x128xf32, #tpu.memory_space<vmem>>, vector<128x128xf32>,
    } else {
    }
    %c0 = arith.constant 0 : index
    %c0_1 = arith.constant 0 : index
    %3 = vector.load %arg2[%c0, %c0_1] : memref<128x128xi8, #tpu.memory_space<vmem>>, vector<128x128xi8>
    %4 = arith.sitofp %3 : vector<128x128xi8> to vector<128x128xbf16>
    %c0_2 = arith.constant 0 : index
    %c0_3 = arith.constant 0 : index
    %5 = vector.load %arg10[%c0_2, %c0_3] : memref<128x128xf32, #tpu.memory_space<vmem>>, vector<128x128xf32>
    %c0_4 = arith.constant 0 : index
    %c0_5 = arith.constant 0 : index
    %6 = vector.load %arg3[%c0_4, %c0_5] : memref<128x128xbf16, #tpu.memory_space<vmem>>, vector<128x128xbf16>
    %cst = arith.constant dense<0.000000e+00> : vector<128x128xf32>
    %7 = tpu.matmul %4, %6, %cst {dimension_numbers = #tpu.dot_dimension_numbers<[1], [0], [0], [1], [0, 0, 1, 1], [], []>} : vector<128x128xbf16>, vector<128x128xbf16>, vector<128x128xf32> -> vector<128x128xf32>
    %8 = arith.addf %5, %7 : vector<128x128xf32>
    %c0_6 = arith.constant 0 : index
    %c0_7 = arith.constant 0 : index
    %9 = vector.load %arg10[%c0_6, %c0_7] : memref<128x128xf32, #tpu.memory_space<vmem>>, vector<128x128xf32>
    tpu.vector_store %arg10[%c0_6, %c0_7], %8 {strides = array<i32>} : memref<128x128xf32, #tpu.memory_space<vmem>>, vector<128x128xf32>,
    %c0_i32_8 = arith.constant 0 : i32
    %10 = arith.cmpi eq, %arg1, %c0_i32_8 : i32
    %11 = arith.extui %10 : i1 to i32
    %c0_i32_9 = arith.constant 0 : i32
    %12 = arith.cmpi ne, %11, %c0_i32_9 : i32
    scf.if %12 {
      %c0_10 = arith.constant 0 : index
      %c0_11 = arith.constant 0 : index
      %13 = vector.load %arg10[%c0_10, %c0_11] : memref<128x128xf32, #tpu.memory_space<vmem>>, vector<128x128xf32>
      %c0_12 = arith.constant 0 : index
      %c0_13 = arith.constant 0 : index
      %14 = vector.load %arg5[%c0_12, %c0_13] : memref<128x1xf32, #tpu.memory_space<vmem>>, vector<128x1xf32>
      %15 = vector.broadcast %14 : vector<128x1xf32> to vector<128x128xf32>
      %16 = arith.mulf %13, %15 : vector<128x128xf32>
      %17 = arith.truncf %16 : vector<128x128xf32> to vector<128x128xbf16>
      %c0_14 = arith.constant 0 : index
      %c0_15 = arith.constant 0 : index
      %18 = vector.load %arg6[%c0_14, %c0_15] : memref<128x128xbf16, #tpu.memory_space<vmem>>, vector<128x128xbf16>
      %cst_16 = arith.constant dense<0.000000e+00> : vector<128x128xf32>
      %19 = tpu.matmul %17, %18, %cst_16 {dimension_numbers = #tpu.dot_dimension_numbers<[1], [0], [0], [1], [0, 0, 1, 1], [], []>} : vector<128x128xbf16>, vector<128x128xbf16>, vector<128x128xf32> -> vector<128x128xf32>
      %c0_17 = arith.constant 0 : index
      %c0_18 = arith.constant 0 : index
      %20 = vector.load %arg4[%c0_17, %c0_18] : memref<128x128xbf16, #tpu.memory_space<vmem>>, vector<128x128xbf16>
      %c0_19 = arith.constant 0 : index
      %c0_20 = arith.constant 0 : index
      %21 = vector.load %arg7[%c0_19, %c0_20] : memref<128x128xbf16, #tpu.memory_space<vmem>>, vector<128x128xbf16>
      %cst_21 = arith.constant dense<0.000000e+00> : vector<128x128xf32>
      %22 = tpu.matmul %20, %21, %cst_21 {dimension_numbers = #tpu.dot_dimension_numbers<[1], [0], [0], [1], [0, 0, 1, 1], [], []>} : vector<128x128xbf16>, vector<128x128xbf16>, vector<128x128xf32> -> vector<128x128xf32>
      %23 = arith.addf %19, %22 : vector<128x128xf32>
      %c0_22 = arith.constant 0 : index
      %c0_23 = arith.constant 0 : index
      %24 = vector.load %arg8[%c0_22, %c0_23] : memref<1x128xf32, #tpu.memory_space<vmem>>, vector<1x128xf32>
      %25 = vector.broadcast %24 : vector<1x128xf32> to vector<128x128xf32>
      %26 = arith.addf %23, %25 : vector<128x128xf32>
      %27 = arith.truncf %26 : vector<128x128xf32> to vector<128x128xbf16>
      %c0_24 = arith.constant 0 : index
      %c0_25 = arith.constant 0 : index
      %28 = vector.load %arg9[%c0_24, %c0_25] : memref<128x128xbf16, #tpu.memory_space<vmem>>, vector<128x128xbf16>
      tpu.vector_store %arg9[%c0_24, %c0_25], %27 {strides = array<i32>} : memref<128x128xbf16, #tpu.memory_space<vmem>>, vector<128x128xbf16>,
    } else {
    }
    return
  }
  func.func @transform_0(%arg0: i32, %arg1: i32) -> (i32, i32) {
    %c0_i32 = arith.constant 0 : i32
    return %arg0, %arg1 : i32, i32
  }
  func.func @transform_1(%arg0: i32, %arg1: i32) -> (i32, i32) {
    %c0_i32 = arith.constant 0 : i32
    %c0_i32_0 = arith.constant 0 : i32
    return %arg1, %c0_i32 : i32, i32
  }
  func.func @transform_2(%arg0: i32, %arg1: i32) -> (i32, i32) {
    %c0_i32 = arith.constant 0 : i32
    %c0_i32_0 = arith.constant 0 : i32
    return %arg0, %c0_i32 : i32, i32
  }
  func.func @transform_3(%arg0: i32, %arg1: i32) -> (i32, i32) {
    %c0_i32 = arith.constant 0 : i32
    %c0_i32_0 = arith.constant 0 : i32
    return %arg0, %c0_i32 : i32, i32
  }
  func.func @transform_4(%arg0: i32, %arg1: i32) -> (i32, i32) {
    %c0_i32 = arith.constant 0 : i32
    %c0_i32_0 = arith.constant 0 : i32
    %c0_i32_1 = arith.constant 0 : i32
    return %c0_i32, %c0_i32_0 : i32, i32
  }
  func.func @transform_5(%arg0: i32, %arg1: i32) -> (i32, i32) {
    %c0_i32 = arith.constant 0 : i32
    %c0_i32_0 = arith.constant 0 : i32
    %c0_i32_1 = arith.constant 0 : i32
    return %c0_i32, %c0_i32_0 : i32, i32
  }
  func.func @transform_6(%arg0: i32, %arg1: i32) -> (i32, i32) {
    %c0_i32 = arith.constant 0 : i32
    %c0_i32_0 = arith.constant 0 : i32
    %c0_i32_1 = arith.constant 0 : i32
    return %c0_i32, %c0_i32_0 : i32, i32
  }
  func.func @transform_7(%arg0: i32, %arg1: i32) -> (i32, i32) {
    %c0_i32 = arith.constant 0 : i32
    %c0_i32_0 = arith.constant 0 : i32
    return %arg0, %c0_i32 : i32, i32
  }
}

module attributes {stable_mosaic.version = 11 : i64} {
  func.func @sage_layer_kernel(%arg0: i32, %arg1: i32, %arg2: memref<128x128xi8, #tpu.memory_space<vmem>>, %arg3: memref<128x8xbf16, #tpu.memory_space<vmem>>, %arg4: memref<128x8xbf16, #tpu.memory_space<vmem>>, %arg5: memref<128x1xf32, #tpu.memory_space<vmem>>, %arg6: memref<8x128xbf16, #tpu.memory_space<vmem>>, %arg7: memref<8x128xbf16, #tpu.memory_space<vmem>>, %arg8: memref<1x128xf32, #tpu.memory_space<vmem>>, %arg9: memref<128x128xbf16, #tpu.memory_space<vmem>>, %arg10: memref<128x8xf32, #tpu.memory_space<vmem>>) attributes {dimension_semantics = [#tpu.dimension_semantics<parallel>, #tpu.dimension_semantics<arbitrary>], iteration_bounds = array<i64: 1, 1>, scalar_prefetch = 0 : i64, scratch_operands = 1 : i64, tpu.core_type = #tpu.core_type<tc>, window_params = [{transform_indices = @transform_0, window_bounds = array<i64: 128, 128>}, {transform_indices = @transform_1, window_bounds = array<i64: 128, 8>}, {transform_indices = @transform_2, window_bounds = array<i64: 128, 8>}, {transform_indices = @transform_3, window_bounds = array<i64: 128, 1>}, {pipeline_mode = #tpu.pipeline_mode<synchronous>, transform_indices = @transform_4, window_bounds = array<i64: 8, 128>}, {pipeline_mode = #tpu.pipeline_mode<synchronous>, transform_indices = @transform_5, window_bounds = array<i64: 8, 128>}, {pipeline_mode = #tpu.pipeline_mode<synchronous>, transform_indices = @transform_6, window_bounds = array<i64: 1, 128>}, {transform_indices = @transform_7, window_bounds = array<i64: 128, 128>}]} {
    %c0_i32 = arith.constant 0 : i32
    %0 = arith.cmpi eq, %arg1, %c0_i32 : i32
    %1 = arith.extui %0 : i1 to i32
    %c0_i32_0 = arith.constant 0 : i32
    %2 = arith.cmpi ne, %1, %c0_i32_0 : i32
    scf.if %2 {
      %cst_10 = arith.constant 0.000000e+00 : f32
      %13 = vector.broadcast %cst_10 : f32 to vector<128x8xf32>
      %c0_11 = arith.constant 0 : index
      %c0_12 = arith.constant 0 : index
      %14 = vector.load %arg10[%c0_11, %c0_12] : memref<128x8xf32, #tpu.memory_space<vmem>>, vector<128x8xf32>
      tpu.vector_store %arg10[%c0_11, %c0_12], %13 {strides = array<i32>} : memref<128x8xf32, #tpu.memory_space<vmem>>, vector<128x8xf32>,
    } else {
    }
    %c0 = arith.constant 0 : index
    %c0_1 = arith.constant 0 : index
    %3 = vector.load %arg2[%c0, %c0_1] : memref<128x128xi8, #tpu.memory_space<vmem>>, vector<128x128xi8>
    %4 = arith.sitofp %3 : vector<128x128xi8> to vector<128x128xbf16>
    %c0_2 = arith.constant 0 : index
    %c0_3 = arith.constant 0 : index
    %5 = vector.load %arg10[%c0_2, %c0_3] : memref<128x8xf32, #tpu.memory_space<vmem>>, vector<128x8xf32>
    %c0_4 = arith.constant 0 : index
    %c0_5 = arith.constant 0 : index
    %6 = vector.load %arg3[%c0_4, %c0_5] : memref<128x8xbf16, #tpu.memory_space<vmem>>, vector<128x8xbf16>
    %cst = arith.constant dense<0.000000e+00> : vector<128x8xf32>
    %7 = tpu.matmul %4, %6, %cst {dimension_numbers = #tpu.dot_dimension_numbers<[1], [0], [0], [1], [0, 0, 1, 1], [], []>} : vector<128x128xbf16>, vector<128x8xbf16>, vector<128x8xf32> -> vector<128x8xf32>
    %8 = arith.addf %5, %7 : vector<128x8xf32>
    %c0_6 = arith.constant 0 : index
    %c0_7 = arith.constant 0 : index
    %9 = vector.load %arg10[%c0_6, %c0_7] : memref<128x8xf32, #tpu.memory_space<vmem>>, vector<128x8xf32>
    tpu.vector_store %arg10[%c0_6, %c0_7], %8 {strides = array<i32>} : memref<128x8xf32, #tpu.memory_space<vmem>>, vector<128x8xf32>,
    %c0_i32_8 = arith.constant 0 : i32
    %10 = arith.cmpi eq, %arg1, %c0_i32_8 : i32
    %11 = arith.extui %10 : i1 to i32
    %c0_i32_9 = arith.constant 0 : i32
    %12 = arith.cmpi ne, %11, %c0_i32_9 : i32
    scf.if %12 {
      %c0_10 = arith.constant 0 : index
      %c0_11 = arith.constant 0 : index
      %13 = vector.load %arg10[%c0_10, %c0_11] : memref<128x8xf32, #tpu.memory_space<vmem>>, vector<128x8xf32>
      %c0_12 = arith.constant 0 : index
      %c0_13 = arith.constant 0 : index
      %14 = vector.load %arg5[%c0_12, %c0_13] : memref<128x1xf32, #tpu.memory_space<vmem>>, vector<128x1xf32>
      %15 = vector.broadcast %14 : vector<128x1xf32> to vector<128x8xf32>
      %16 = arith.mulf %13, %15 : vector<128x8xf32>
      %17 = arith.truncf %16 : vector<128x8xf32> to vector<128x8xbf16>
      %c0_14 = arith.constant 0 : index
      %c0_15 = arith.constant 0 : index
      %18 = vector.load %arg6[%c0_14, %c0_15] : memref<8x128xbf16, #tpu.memory_space<vmem>>, vector<8x128xbf16>
      %cst_16 = arith.constant dense<0.000000e+00> : vector<128x128xf32>
      %19 = tpu.matmul %17, %18, %cst_16 {dimension_numbers = #tpu.dot_dimension_numbers<[1], [0], [0], [1], [0, 0, 1, 1], [], []>} : vector<128x8xbf16>, vector<8x128xbf16>, vector<128x128xf32> -> vector<128x128xf32>
      %c0_17 = arith.constant 0 : index
      %c0_18 = arith.constant 0 : index
      %20 = vector.load %arg4[%c0_17, %c0_18] : memref<128x8xbf16, #tpu.memory_space<vmem>>, vector<128x8xbf16>
      %c0_19 = arith.constant 0 : index
      %c0_20 = arith.constant 0 : index
      %21 = vector.load %arg7[%c0_19, %c0_20] : memref<8x128xbf16, #tpu.memory_space<vmem>>, vector<8x128xbf16>
      %cst_21 = arith.constant dense<0.000000e+00> : vector<128x128xf32>
      %22 = tpu.matmul %20, %21, %cst_21 {dimension_numbers = #tpu.dot_dimension_numbers<[1], [0], [0], [1], [0, 0, 1, 1], [], []>} : vector<128x8xbf16>, vector<8x128xbf16>, vector<128x128xf32> -> vector<128x128xf32>
      %23 = arith.addf %19, %22 : vector<128x128xf32>
      %c0_22 = arith.constant 0 : index
      %c0_23 = arith.constant 0 : index
      %24 = vector.load %arg8[%c0_22, %c0_23] : memref<1x128xf32, #tpu.memory_space<vmem>>, vector<1x128xf32>
      %25 = vector.broadcast %24 : vector<1x128xf32> to vector<128x128xf32>
      %26 = arith.addf %23, %25 : vector<128x128xf32>
      %27 = arith.truncf %26 : vector<128x128xf32> to vector<128x128xbf16>
      %c0_24 = arith.constant 0 : index
      %c0_25 = arith.constant 0 : index
      %28 = vector.load %arg9[%c0_24, %c0_25] : memref<128x128xbf16, #tpu.memory_space<vmem>>, vector<128x128xbf16>
      tpu.vector_store %arg9[%c0_24, %c0_25], %27 {strides = array<i32>} : memref<128x128xbf16, #tpu.memory_space<vmem>>, vector<128x128xbf16>,
    } else {
    }
    return
  }
  func.func @transform_0(%arg0: i32, %arg1: i32) -> (i32, i32) {
    %c0_i32 = arith.constant 0 : i32
    return %arg0, %arg1 : i32, i32
  }
  func.func @transform_1(%arg0: i32, %arg1: i32) -> (i32, i32) {
    %c0_i32 = arith.constant 0 : i32
    %c0_i32_0 = arith.constant 0 : i32
    return %arg1, %c0_i32 : i32, i32
  }
  func.func @transform_2(%arg0: i32, %arg1: i32) -> (i32, i32) {
    %c0_i32 = arith.constant 0 : i32
    %c0_i32_0 = arith.constant 0 : i32
    return %arg0, %c0_i32 : i32, i32
  }
  func.func @transform_3(%arg0: i32, %arg1: i32) -> (i32, i32) {
    %c0_i32 = arith.constant 0 : i32
    %c0_i32_0 = arith.constant 0 : i32
    return %arg0, %c0_i32 : i32, i32
  }
  func.func @transform_4(%arg0: i32, %arg1: i32) -> (i32, i32) {
    %c0_i32 = arith.constant 0 : i32
    %c0_i32_0 = arith.constant 0 : i32
    %c0_i32_1 = arith.constant 0 : i32
    return %c0_i32, %c0_i32_0 : i32, i32
  }
  func.func @transform_5(%arg0: i32, %arg1: i32) -> (i32, i32) {
    %c0_i32 = arith.constant 0 : i32
    %c0_i32_0 = arith.constant 0 : i32
    %c0_i32_1 = arith.constant 0 : i32
    return %c0_i32, %c0_i32_0 : i32, i32
  }
  func.func @transform_6(%arg0: i32, %arg1: i32) -> (i32, i32) {
    %c0_i32 = arith.constant 0 : i32
    %c0_i32_0 = arith.constant 0 : i32
    %c0_i32_1 = arith.constant 0 : i32
    return %c0_i32, %c0_i32_0 : i32, i32
  }
  func.func @transform_7(%arg0: i32, %arg1: i32) -> (i32, i32) {
    %c0_i32 = arith.constant 0 : i32
    %c0_i32_0 = arith.constant 0 : i32
    return %arg0, %c0_i32 : i32, i32
  }
}

</mosaic_0001>

<bundles_post_ra>
// kernel: graphsage_forward.3
= control target key start
LH: loop header
LB: loop body
LE: loop exit
PB: predicated region body
PF: predicated region fallthrough
CT: control target
= control target key end

     0   :  { %v1223_v1 = vmov 0   ;;  %s1451_s1 = inlined_call_operand.vmem [shape: bf16[128,128], index: 1, kind: input, shape index: {}, may-alias: {1,2}]   ;;  %s1452_s0 = inlined_call_operand.vmem [shape: s8[128,128], index: 0, kind: input, shape index: {}]   ;;  %s1453_s3 = inlined_call_operand.vmem [shape: f32[128,1], index: 3, kind: input, shape index: {}]   ;;  %s1454_s5 = inlined_call_operand.vmem [shape: bf16[128,128], index: 5, kind: input, shape index: {}]   ;;  %s1455_s4 = inlined_call_operand.vmem [shape: bf16[128,128], index: 4, kind: input, shape index: {}]   ;;  %s1456_s2 = inlined_call_operand.vmem [shape: bf16[128,128], index: 2, kind: input, shape index: {}, may-alias: {1,2}]   ;;  %s1457_s6 = inlined_call_operand.vmem [shape: f32[1,128], index: 6, kind: input, shape index: {}]   ;;  %s1458_s7 = inlined_call_operand.vmem [shape: bf16[128,128], index: 7, kind: output, shape index: {}]  }
   0x1   :  { %v1191_v0 = vld [vmem:[%s1451_s1] sm:$0xff]   ;;  %1190 = vset.pattern.permute.xlu1 %v1223_v1  ;;  %1189 = vset.pattern.permute.xlu0 %v1223_v1  ;;  %v1192_v2 = vld [vmem:[%s1451_s1 + $0x8] sm:$0xff]   ;;  %v1193_v3 = vld [vmem:[%s1451_s1 + $0x10] sm:$0xff]  }
   0x2   :  { %1060 = vmatprep.subr.bf16.mxu0 %v1191_v0  ;;  %v1194_v4 = vld [vmem:[%s1451_s1 + $0x18] sm:$0xff]   ;;  %v1279_v5 = vld [vmem:[%s1452_s0] sm:$0xff]  ;;  %v289_v7 = vld [vmem:[%s1453_s3 + $0x10] sm:$0xff] }
   0x3   :  { %1061 = vmatpush3.bf16.msra.mxu0 %v1191_v0  ;;  %v51_v6 = vunpack.c.l.s8.bf16 %v1279_v5  ;;  %v287_v8 = vld [vmem:[%s1453_s3] sm:$0xff]  ;;  %315 = vperm.xlu1 %1190, %v289_v7   ;;  %v290_v9 = vld [vmem:[%s1453_s3 + $0x18] sm:$0xff]  ;;  %v288_v10 = vld [vmem:[%s1453_s3 + $0x8] sm:$0xff]  ;;  %v52_v32 = vunpack.c.h.s8.bf16 %v1279_v5 }
   0x4   :  { %1062 = vmatprep.subr.bf16.mxu0 %v1192_v2  ;;  %305 = vperm.xlu0 %1189, %v287_v8   ;;  %v1195_v11 = vld [vmem:[%s1451_s1 + $0x20] sm:$0xff]   ;;  %v1196_v12 = vld [vmem:[%s1451_s1 + $0x28] sm:$0xff]   ;;  %v1197_v17 = vld [vmem:[%s1451_s1 + $0x30] sm:$0xff]  }
   0x5   :  { %1076 = vmatprep.mubr.bf16.mxu0 %v51_v6  ;;  %v296_v13 = vld [vmem:[%s1453_s3 + $0x48] sm:$0xff]  ;;  %v295_v14 = vld [vmem:[%s1453_s3 + $0x40] sm:$0xff]  ;;  %v298_v18 = vld [vmem:[%s1453_s3 + $0x58] sm:$0xff] }
   0x6   :  { %v1199_v15 = vld [vmem:[%s1454_s5] sm:$0xff]   ;;  %v1200_v16 = vld [vmem:[%s1454_s5 + $0x8] sm:$0xff]   ;;  %v297_v19 = vld [vmem:[%s1453_s3 + $0x50] sm:$0xff] }
   0x7   :  { %1063 = vmatpush3.bf16.msra.mxu0 %v1192_v2  ;;  %320 = vperm.xlu1 %1190, %v290_v9   ;;  %v1201_v20 = vld [vmem:[%s1454_s5 + $0x10] sm:$0xff]   ;;  %v1198_v21 = vld [vmem:[%s1451_s1 + $0x38] sm:$0xff]   ;;  %v292_v22 = vld [vmem:[%s1453_s3 + $0x28] sm:$0xff] }
   0x8   :  { %1064 = vmatprep.subr.bf16.mxu0 %v1193_v3  ;;  %310 = vperm.xlu0 %1189, %v288_v10   ;;  %v291_v23 = vld [vmem:[%s1453_s3 + $0x20] sm:$0xff]  ;;  %v1202_v24 = vld [vmem:[%s1454_s5 + $0x18] sm:$0xff]   ;;  %v293_v26 = vld [vmem:[%s1453_s3 + $0x30] sm:$0xff] }
   0x9   :  { %1092 = vmatprep.subr.bf16.mxu1 %v1199_v15  ;;  %v294_v25 = vld [vmem:[%s1453_s3 + $0x38] sm:$0xff]  ;;  %v48_v27 = vld [vmem:[%s1452_s0 + $0x8] sm:$0xff]  ;;  %v1210_v28 = vld [vmem:[%s1456_s2] sm:$0xff]  }
   0xa   :  { %1093 = vmatpush3.bf16.msra.mxu1 %v1199_v15  ;;  %v1203_v29 = vld [vmem:[%s1454_s5 + $0x20] sm:$0xff]   ;;  %v300_v31 = vld [vmem:[%s1453_s3 + $0x68] sm:$0xff]  ;;  %1108 = vmatprep.mubr.bf16.mxu1 %v1210_v28  ;;  %v53_v34 = vunpack.c.l.s8.bf16 %v48_v27  ;;  %v49_v37 = vld [vmem:[%s1452_s0 + $0x10] sm:$0xff]  ;;  %v54_v42 = vunpack.c.h.s8.bf16 %v48_v27 }
   0xb   :  { %1065 = vmatpush3.bf16.msra.mxu0 %v1193_v3  ;;  %350 = vperm.xlu1 %1190, %v296_v13   ;;  %v1204_v30 = vld [vmem:[%s1455_s4] sm:$0xff]   ;;  %v1205_v35 = vld [vmem:[%s1454_s5 + $0x28] sm:$0xff]   ;;  %v302_v38 = vld [vmem:[%s1453_s3 + $0x78] sm:$0xff]  ;;  %v55_v43 = vunpack.c.l.s8.bf16 %v49_v37  ;;  %v56_v48 = vunpack.c.h.s8.bf16 %v49_v37 }
   0xc   :  { %1066 = vmatprep.subr.bf16.mxu0 %v1194_v4  ;;  %345 = vperm.xlu0 %1189, %v295_v14   ;;  %v299_v33 = vld [vmem:[%s1453_s3 + $0x60] sm:$0xff]  ;;  %v1206_v36 = vld [vmem:[%s1455_s4 + $0x8] sm:$0xff]   ;;  %v301_v39 = vld [vmem:[%s1453_s3 + $0x70] sm:$0xff] }
   0xd   :  { %1094 = vmatprep.subr.bf16.mxu1 %v1200_v16  ;;  %v1207_v40 = vld [vmem:[%s1454_s5 + $0x30] sm:$0xff]   ;;  %v1209_v44 = vld [vmem:[%s1454_s5 + $0x38] sm:$0xff]   ;;  %v1213_v47 = vld [vmem:[%s1455_s4 + $0x20] sm:$0xff]  }
   0xe   :  { %1095 = vmatpush3.bf16.msra.mxu1 %v1200_v16  ;;  %v1208_v41 = vld [vmem:[%s1455_s4 + $0x10] sm:$0xff]   ;;  %v1211_v45 = vld [vmem:[%s1455_s4 + $0x18] sm:$0xff]   ;;  %v1212_v50 = vld [vmem:[%s1456_s2 + $0x8] sm:$0xff]  }
   0xf   :  { %1067 = vmatpush3.bf16.msra.mxu0 %v1194_v4  ;;  %360 = vperm.xlu1 %1190, %v298_v18   ;;  %v50_v46 = vld [vmem:[%s1452_s0 + $0x18] sm:$0xff]  ;;  %v1214_v51 = vld [vmem:[%s1456_s2 + $0x10] sm:$0xff]   ;;  %v1215_v52 = vld [vmem:[%s1455_s4 + $0x28] sm:$0xff]  }
  0x10   :  { %1068 = vmatprep.subr.bf16.mxu0 %v1195_v11  ;;  %355 = vperm.xlu0 %1189, %v297_v19   ;;  %v57_v49 = vunpack.c.l.s8.bf16 %v50_v46  ;;  %v58_v53 = vunpack.c.h.s8.bf16 %v50_v46  ;;  %v1216_v54 = vld [vmem:[%s1456_s2 + $0x18] sm:$0xff]   ;;  %v1217_v55 = vld [vmem:[%s1455_s4 + $0x30] sm:$0xff]   ;;  %v1219_v57 = vld [vmem:[%s1456_s2 + $0x20] sm:$0xff]  }
  0x11   :  { %1096 = vmatprep.subr.bf16.mxu1 %v1201_v20  ;;  %v1218_v56 = vld [vmem:[%s1455_s4 + $0x38] sm:$0xff]   ;;  %v1220_v58 = vld [vmem:[%s1456_s2 + $0x28] sm:$0xff]   ;;  %v1221_v59 = vld [vmem:[%s1456_s2 + $0x30] sm:$0xff]  }
  0x12   :  { %1097 = vmatpush3.bf16.msra.mxu1 %v1201_v20  ;;  %v1222_v60 = vld [vmem:[%s1456_s2 + $0x38] sm:$0xff]  }
  0x13   :  { %1069 = vmatpush3.bf16.msra.mxu0 %v1195_v11  ;;  %330 = vperm.xlu1 %1190, %v292_v22  }
  0x14   :  { %1070 = vmatprep.subr.bf16.mxu0 %v1196_v12  ;;  %325 = vperm.xlu0 %1189, %v291_v23  }
  0x15   :  { %1098 = vmatprep.subr.bf16.mxu1 %v1202_v24 }
  0x16   :  { %1099 = vmatpush3.bf16.msra.mxu1 %v1202_v24 }
  0x17   :  { %1071 = vmatpush3.bf16.msra.mxu0 %v1196_v12  ;;  %340 = vperm.xlu1 %1190, %v294_v25  }
  0x18   :  { %1072 = vmatprep.subr.bf16.mxu0 %v1197_v17  ;;  %335 = vperm.xlu0 %1189, %v293_v26  }
  0x19   :  { %1100 = vmatprep.subr.bf16.mxu1 %v1203_v29 }
  0x1a   :  { %1101 = vmatpush3.bf16.msra.mxu1 %v1203_v29 }
  0x1b   :  { %1073 = vmatpush3.bf16.msra.mxu0 %v1197_v17  ;;  %370 = vperm.xlu1 %1190, %v300_v31  }
  0x1c   :  { %1074 = vmatprep.subr.bf16.mxu0 %v1198_v21  ;;  %365 = vperm.xlu0 %1189, %v299_v33  }
  0x1d   :  { %1102 = vmatprep.subr.bf16.mxu1 %v1205_v35 }
  0x1e   :  { %1103 = vmatpush3.bf16.msra.mxu1 %v1205_v35 }
  0x1f   :  { %1075 = vmatpush3.bf16.msra.mxu0 %v1198_v21  ;;  %380 = vperm.xlu1 %1190, %v302_v38  }
  0x20   :  { %1124 = vmatprep.subr.bf16.mxu0 %v1204_v30  ;;  %375 = vperm.xlu0 %1189, %v301_v39  }
  0x21   :  { %1104 = vmatprep.subr.bf16.mxu1 %v1207_v40 }
  0x22   :  { %1077 = vmatmul.mubr.bf16.vlgmr.msra.gmra.mrb[0].mxu0 %v52_v32  ;;  %1105 = vmatpush3.bf16.msra.mxu1 %v1207_v40 }
  0x23   :  { %1080 = vmatprep.mubr.bf16.mxu0 %v53_v34  ;;  %1125 = vmatpush3.bf16.msra.mxu0 %v1204_v30 }
  0x24   :  { %1126 = vmatprep.subr.bf16.mxu0 %v1206_v36  ;;  %1106 = vmatprep.subr.bf16.mxu1 %v1209_v44 }
  0x26   :  { %1107 = vmatpush3.bf16.msra.mxu1 %v1209_v44 }
  0x27   :  { %1127 = vmatpush3.bf16.msra.mxu0 %v1206_v36  ;;  %1156 = vmatprep.subr.bf16.mxu1 %v1204_v30 }
  0x28   :  { %1128 = vmatprep.subr.bf16.mxu0 %v1208_v41 }
  0x29   :  { %1109 = vmatmul.mubr.bf16.vlgmr.msra.gmra.mrb[0].mxu1 %v1212_v50 }
  0x2a   :  { %1081 = vmatmul.mubr.bf16.gmra.mrb[4].mxu0 %v54_v42  ;;  %1164 = vmatpush3.bf16.msra.mxu1 %v1204_v30 }
  0x2b   :  { %1084 = vmatprep.mubr.bf16.mxu0 %v55_v43  ;;  %1129 = vmatpush3.bf16.msra.mxu0 %v1208_v41 }
  0x2c   :  { %1130 = vmatprep.subr.bf16.mxu0 %v1211_v45  ;;  %1157 = vmatprep.subr.bf16.mxu1 %v1206_v36 }
  0x2d   :  { %1112 = vmatprep.mubr.bf16.mxu1 %v1214_v51 }
  0x2e   :  { %1165 = vmatpush3.bf16.msra.mxu1 %v1206_v36 }
  0x2f   :  { %1131 = vmatpush3.bf16.msra.mxu0 %v1211_v45  ;;  %1158 = vmatprep.subr.bf16.mxu1 %v1208_v41 }
  0x30   :  { %1132 = vmatprep.subr.bf16.mxu0 %v1213_v47 }
  0x31   :  { %1113 = vmatmul.mubr.bf16.gmra.mrb[4].mxu1 %v1216_v54 }
  0x32   :  { %1085 = vmatmul.mubr.bf16.gmra.mrb[8].mxu0 %v56_v48  ;;  %1166 = vmatpush3.bf16.msra.mxu1 %v1208_v41 }
  0x33   :  { %1088 = vmatprep.mubr.bf16.mxu0 %v57_v49  ;;  %1133 = vmatpush3.bf16.msra.mxu0 %v1213_v47 }
  0x34   :  { %1134 = vmatprep.subr.bf16.mxu0 %v1215_v52  ;;  %1159 = vmatprep.subr.bf16.mxu1 %v1211_v45 }
  0x35   :  { %1116 = vmatprep.mubr.bf16.mxu1 %v1219_v57 }
  0x36   :  { %1167 = vmatpush3.bf16.msra.mxu1 %v1211_v45 }
  0x37   :  { %1135 = vmatpush3.bf16.msra.mxu0 %v1215_v52  ;;  %1160 = vmatprep.subr.bf16.mxu1 %v1213_v47 }
  0x38   :  { %1136 = vmatprep.subr.bf16.mxu0 %v1217_v55 }
  0x39   :  { %1117 = vmatmul.mubr.bf16.gmra.mrb[8].mxu1 %v1220_v58 }
  0x3a   :  { %1089 = vmatmul.mubr.bf16.gmra.mrb[12].mxu0 %v58_v53  ;;  %1168 = vmatpush3.bf16.msra.mxu1 %v1213_v47 }
  0x3b   :  { %1161 = vmatprep.subr.bf16.mxu1 %v1215_v52  ;;  %1137 = vmatpush3.bf16.msra.mxu0 %v1217_v55 }
  0x3c   :  { %1138 = vmatprep.subr.bf16.mxu0 %v1218_v56  ;;  %1120 = vmatprep.mubr.bf16.mxu1 %v1221_v59 }
  0x3e   :  { %1169 = vmatpush3.bf16.msra.mxu1 %v1215_v52 }
  0x3f   :  { %1162 = vmatprep.subr.bf16.mxu1 %v1217_v55  ;;  %1139 = vmatpush3.bf16.msra.mxu0 %v1218_v56 }
  0x41   :  { %1121 = vmatmul.mubr.bf16.gmra.mrb[12].mxu1 %v1222_v60 }
  0x42   :  { %1170 = vmatpush3.bf16.msra.mxu1 %v1217_v55 }
  0x43   :  { %1163 = vmatprep.subr.bf16.mxu1 %v1218_v56 }
  0x46   :  { %1171 = vmatpush3.bf16.msra.mxu1 %v1218_v56 }
  0x82   :  { %v316_v61 = vpop.permute.xlu1 %315 }
  0x83   :  { %v306_v62 = vpop.permute.xlu0 %305 }
  0x86   :  { %v321_v63 = vpop.permute.xlu1 %320 }
  0x87   :  { %v311_v0 = vpop.permute.xlu0 %310 }
  0x8a   :  { %v351_v1 = vpop.permute.xlu1 %350 }
  0x8b   :  { %v346_v2 = vpop.permute.xlu0 %345 }
  0x8e   :  { %v361_v3 = vpop.permute.xlu1 %360 }
  0x8f   :  { %v356_v4 = vpop.permute.xlu0 %355 }
  0x92   :  { %v331_v8 = vpop.permute.xlu1 %330 }
  0x93   :  { %v326_v12 = vpop.permute.xlu0 %325 }
  0x96   :  { %v341_v18 = vpop.permute.xlu1 %340 }
  0x97   :  { %v336_v20 = vpop.permute.xlu0 %335 }
  0x9a   :  { %v371_v29 = vpop.permute.xlu1 %370 }
  0x9b   :  { %v366_v30 = vpop.permute.xlu0 %365 }
  0x9e   :  { %v381_v45 = vpop.permute.xlu1 %380 }
  0x9f   :  { %v376_v46 = vpop.permute.xlu0 %375 }
  0xf5   :  { %v1078_v5 = vpop.f32.mrb[0].mxu0 }
  0xf6   :  { %v173_v6 = vpop.f32.mrb[1].mxu0  ;;  %v385_v9 = vmul.f32 %v1078_v5, %v316_v61 }
  0xf7   :  { %v1079_v7 = vpop.f32.mrb[2].mxu0  ;;  %v383_v13 = vmul.f32 %v306_v62, %v173_v6 }
  0xf8   :  { %v386_v10 = vmul.f32 %v1079_v7, %v321_v63  ;;  %v176_v11 = vpop.f32.mrb[3].mxu0 }
  0xf9   :  { %v384_v14 = vmul.f32 %v311_v0, %v176_v11  ;;  %v932_v0 = vld [vmem:[%s1457_s6] ss:$0 sm:$0xff] }
  0xfa   :  { %v400_v15 = vpack.c.bf16 %v386_v10, %v385_v9 }
  0xfb   :  { %v399_v16 = vpack.c.bf16 %v384_v14, %v383_v13 }
  0xfc   :  { %v1110_v33 = vpop.f32.mrb[0].mxu1 }
  0xfd   :  { %v1082_v17 = vpop.f32.mrb[4].mxu0  ;;  %1140 = vmatprep.mubr.bf16.mxu0 %v399_v16  ;;  %v585_v35 = vpop.f32.mrb[1].mxu1 }
  0xfe   :  { %v189_v19 = vpop.f32.mrb[5].mxu0  ;;  %1141 = vmatmul.mubr.bf16.vlgmr.msra.gmra.mrb[16].mxu0 %v400_v15  ;;  %v389_v22 = vmul.f32 %v1082_v17, %v336_v20  ;;  %v1111_v39 = vpop.f32.mrb[2].mxu1 }
  0xff   :  { %v1083_v21 = vpop.f32.mrb[6].mxu0  ;;  %v387_v25 = vmul.f32 %v326_v12, %v189_v19  ;;  %v588_v42 = vpop.f32.mrb[3].mxu1 }
 0x100   :  { %v390_v23 = vmul.f32 %v1083_v21, %v341_v18  ;;  %v192_v24 = vpop.f32.mrb[7].mxu0 }
 0x101   :  { %v388_v26 = vmul.f32 %v331_v8, %v192_v24 }
 0x102   :  { %v402_v27 = vpack.c.bf16 %v390_v23, %v389_v22 }
 0x103   :  { %v401_v28 = vpack.c.bf16 %v388_v26, %v387_v25 }
 0x104   :  { %v1114_v49 = vpop.f32.mrb[4].mxu1 }
 0x105   :  { %v1086_v31 = vpop.f32.mrb[8].mxu0  ;;  %1144 = vmatprep.mubr.bf16.mxu0 %v401_v28  ;;  %v601_v51 = vpop.f32.mrb[5].mxu1 }
 0x106   :  { %v205_v32 = vpop.f32.mrb[9].mxu0  ;;  %1145 = vmatmul.mubr.bf16.gmra.mrb[20].mxu0 %v402_v27  ;;  %v393_v36 = vmul.f32 %v1086_v31, %v356_v4  ;;  %v1115_v55 = vpop.f32.mrb[6].mxu1 }
 0x107   :  { %v1087_v34 = vpop.f32.mrb[10].mxu0  ;;  %v391_v40 = vmul.f32 %v346_v2, %v205_v32  ;;  %v604_v58 = vpop.f32.mrb[7].mxu1 }
 0x108   :  { %v394_v37 = vmul.f32 %v1087_v34, %v361_v3  ;;  %v208_v38 = vpop.f32.mrb[11].mxu0 }
 0x109   :  { %v392_v41 = vmul.f32 %v351_v1, %v208_v38 }
 0x10a   :  { %v404_v43 = vpack.c.bf16 %v394_v37, %v393_v36 }
 0x10b   :  { %v403_v44 = vpack.c.bf16 %v392_v41, %v391_v40 }
 0x10d   :  { %v1090_v47 = vpop.f32.mrb[12].mxu0  ;;  %1148 = vmatprep.mubr.bf16.mxu1 %v403_v44 }
 0x10e   :  { %v221_v48 = vpop.f32.mrb[13].mxu0  ;;  %1149 = vmatmul.mubr.bf16.vlgmr.msra.gmra.mrb[8].mxu1 %v404_v43  ;;  %v397_v52 = vmul.f32 %v1090_v47, %v376_v46 }
 0x10f   :  { %v1091_v50 = vpop.f32.mrb[14].mxu0  ;;  %v395_v56 = vmul.f32 %v366_v30, %v221_v48 }
 0x110   :  { %v398_v53 = vmul.f32 %v1091_v50, %v381_v45  ;;  %v224_v54 = vpop.f32.mrb[15].mxu0 }
 0x111   :  { %v396_v57 = vmul.f32 %v371_v29, %v224_v54 }
 0x112   :  { %v406_v59 = vpack.c.bf16 %v398_v53, %v397_v52 }
 0x113   :  { %v405_v60 = vpack.c.bf16 %v396_v57, %v395_v56 }
 0x115   :  { %1152 = vmatprep.mubr.bf16.mxu1 %v405_v60 }
 0x116   :  { %1153 = vmatmul.mubr.bf16.gmra.mrb[12].mxu1 %v406_v59 }
 0x1d1   :  { %v1142_v61 = vpop.f32.mrb[16].mxu0 }
 0x1d2   :  { %v739_v62 = vadd.f32 %v1142_v61, %v1110_v33  ;;  %v730_v63 = vpop.f32.mrb[17].mxu0 }
 0x1d3   :  { %v731_v1 = vadd.f32 %v730_v63, %v585_v35  ;;  %v1143_v2 = vpop.f32.mrb[18].mxu0 }
 0x1d4   :  { %v742_v3 = vadd.f32 %v1143_v2, %v1111_v39  ;;  %v733_v4 = vpop.f32.mrb[19].mxu0  ;;  %v802_v6 = vadd.f32 %v932_v0, %v739_v62 }
 0x1d5   :  { %v734_v5 = vadd.f32 %v733_v4, %v588_v42  ;;  %v800_v8 = vadd.f32 %v932_v0, %v731_v1 }
 0x1d6   :  { %v803_v7 = vadd.f32 %v932_v0, %v742_v3 }
 0x1d7   :  { %v801_v9 = vadd.f32 %v932_v0, %v734_v5 }
 0x1d8   :  { %v973_v10 = vpack.c.bf16 %v803_v7, %v802_v6 }
 0x1d9   :  { %v968_v11 = vpack.c.bf16 %v801_v9, %v800_v8  ;;  %v1146_v12 = vpop.f32.mrb[20].mxu0 }
 0x1da   :  { %1005 = vst [vmem:[%s1458_s7 + $0x8] sm:$0xff] %v973_v10   ;;  %v755_v13 = vadd.f32 %v1146_v12, %v1114_v49  ;;  %v746_v14 = vpop.f32.mrb[21].mxu0 }
 0x1db   :  { %969 = vst [vmem:[%s1458_s7] sm:$0xff] %v968_v11   ;;  %v747_v15 = vadd.f32 %v746_v14, %v601_v51  ;;  %v1147_v16 = vpop.f32.mrb[22].mxu0 }
 0x1dc   :  { %v758_v17 = vadd.f32 %v1147_v16, %v1115_v55  ;;  %v749_v18 = vpop.f32.mrb[23].mxu0  ;;  %v806_v20 = vadd.f32 %v932_v0, %v755_v13 }
 0x1dd   :  { %v750_v19 = vadd.f32 %v749_v18, %v604_v58  ;;  %v804_v22 = vadd.f32 %v932_v0, %v747_v15 }
 0x1de   :  { %v807_v21 = vadd.f32 %v932_v0, %v758_v17 }
 0x1df   :  { %v805_v23 = vadd.f32 %v932_v0, %v750_v19 }
 0x1e0   :  { %v983_v24 = vpack.c.bf16 %v807_v21, %v806_v20 }
 0x1e1   :  { %v978_v25 = vpack.c.bf16 %v805_v23, %v804_v22  ;;  %v1150_v26 = vpop.f32.mrb[8].mxu1 }
 0x1e2   :  { %1007 = vst [vmem:[%s1458_s7 + $0x18] sm:$0xff] %v983_v24   ;;  %v762_v27 = vpop.f32.mrb[9].mxu1  ;;  %v810_v29 = vadd.f32 %v1150_v26, %v932_v0 }
 0x1e3   :  { %1006 = vst [vmem:[%s1458_s7 + $0x10] sm:$0xff] %v978_v25   ;;  %v1151_v28 = vpop.f32.mrb[10].mxu1  ;;  %v808_v32 = vadd.f32 %v932_v0, %v762_v27 }
 0x1e4   :  { %v811_v30 = vadd.f32 %v1151_v28, %v932_v0  ;;  %v765_v31 = vpop.f32.mrb[11].mxu1 }
 0x1e5   :  { %v809_v33 = vadd.f32 %v932_v0, %v765_v31 }
 0x1e6   :  { %v993_v34 = vpack.c.bf16 %v811_v30, %v810_v29 }
 0x1e7   :  { %v988_v35 = vpack.c.bf16 %v809_v33, %v808_v32 }
 0x1e8   :  { %1009 = vst [vmem:[%s1458_s7 + $0x28] sm:$0xff] %v993_v34  }
 0x1e9   :  { %1008 = vst [vmem:[%s1458_s7 + $0x20] sm:$0xff] %v988_v35   ;;  %v1154_v36 = vpop.f32.mrb[12].mxu1 }
 0x1ea   :  { %v778_v37 = vpop.f32.mrb[13].mxu1  ;;  %v814_v39 = vadd.f32 %v1154_v36, %v932_v0 }
 0x1eb   :  { %v1155_v38 = vpop.f32.mrb[14].mxu1  ;;  %v812_v42 = vadd.f32 %v932_v0, %v778_v37 }
 0x1ec   :  { %v815_v40 = vadd.f32 %v1155_v38, %v932_v0  ;;  %v781_v41 = vpop.f32.mrb[15].mxu1 }
 0x1ed   :  { %v813_v43 = vadd.f32 %v932_v0, %v781_v41 }
 0x1ee   :  { %v1003_v44 = vpack.c.bf16 %v815_v40, %v814_v39 }
 0x1ef   :  { %v998_v45 = vpack.c.bf16 %v813_v43, %v812_v42 }
 0x1f0   :  { %1011 = vst [vmem:[%s1458_s7 + $0x38] sm:$0xff] %v1003_v44  }
 0x1f1   :  { %1010 = vst [vmem:[%s1458_s7 + $0x30] sm:$0xff] %v998_v45  }

// kernel: graphsage_forward.2
= control target key start
LH: loop header
LB: loop body
LE: loop exit
PB: predicated region body
PF: predicated region fallthrough
CT: control target
= control target key end

     0   :  { %v1075_v1 = vmov 0   ;;  %vm491_vm0 = vcmask 1043456   ;;  %vm31_vm1 = vcmask 64512   ;;  %v1076_v29 = vmov 0.0   ;;  %s1314_s1 = inlined_call_operand.vmem [shape: bf16[128,8], index: 1, kind: input, shape index: {}, may-alias: {1,2}]   ;;  %s1315_s0 = inlined_call_operand.vmem [shape: s8[128,128], index: 0, kind: input, shape index: {}]   ;;  %s1316_s3 = inlined_call_operand.vmem [shape: f32[128,1], index: 3, kind: input, shape index: {}]   ;;  %s1317_s5 = inlined_call_operand.vmem [shape: bf16[8,128], index: 5, kind: input, shape index: {}]   ;;  %s1318_s4 = inlined_call_operand.vmem [shape: bf16[8,128], index: 4, kind: input, shape index: {}]   ;;  %s1319_s2 = inlined_call_operand.vmem [shape: bf16[128,8], index: 2, kind: input, shape index: {}, may-alias: {1,2}]   ;;  %s1320_s6 = inlined_call_operand.vmem [shape: f32[1,128], index: 6, kind: input, shape index: {}]   ;;  %s1321_s7 = inlined_call_operand.vmem [shape: bf16[128,128], index: 7, kind: output, shape index: {}]  }
   0x1   :  { %v1059_v0 = vld [vmem:[%s1314_s1] sm:$0xff]   ;;  %1057 = vset.pattern.permute.xlu0 %v1075_v1  ;;  %1058 = vset.pattern.permute.xlu1 %v1075_v1  ;;  %v1060_v2 = vld [vmem:[%s1314_s1 + $0x8] sm:$0xff]   ;;  %v1061_v3 = vld [vmem:[%s1314_s1 + $0x10] sm:$0xff]   ;;  %34 = vst.msk [vmem:[#allocation2 + $0x10] sm:$0xff] %vm31_vm1, %v1076_v29 }
   0x2   :  { %969 = vmatprep.subr.bf16.mxu0 %v1059_v0  ;;  %v1062_v4 = vld [vmem:[%s1314_s1 + $0x18] sm:$0xff]   ;;  %v1132_v5 = vld [vmem:[%s1315_s0] sm:$0xff]  ;;  %v291_v8 = vld [vmem:[%s1316_s3 + $0x10] sm:$0xff]  ;;  %32 = vst.msk [vmem:[#allocation2] sm:$0xff] %vm31_vm1, %v1076_v29 }
   0x3   :  { %970 = vmatpush3.bf16.msra.mxu0 %v1059_v0  ;;  %v52_v6 = vunpack.c.l.s8.bf16 %v1132_v5  ;;  %v289_v7 = vld [vmem:[%s1316_s3] sm:$0xff]  ;;  %317 = vperm.xlu1 %1058, %v291_v8   ;;  %v290_v9 = vld [vmem:[%s1316_s3 + $0x8] sm:$0xff]  ;;  %v292_v10 = vld [vmem:[%s1316_s3 + $0x18] sm:$0xff]  ;;  %33 = vst.msk [vmem:[#allocation2 + $0x8] sm:$0xff] %vm31_vm1, %v1076_v29  ;;  %v53_v33 = vunpack.c.h.s8.bf16 %v1132_v5 }
   0x4   :  { %971 = vmatprep.subr.bf16.mxu0 %v1060_v2  ;;  %307 = vperm.xlu0 %1057, %v289_v7   ;;  %v1063_v11 = vld [vmem:[%s1314_s1 + $0x20] sm:$0xff]   ;;  %v1064_v12 = vld [vmem:[%s1314_s1 + $0x28] sm:$0xff]   ;;  %v295_v19 = vld [vmem:[%s1316_s3 + $0x30] sm:$0xff]  ;;  %35 = vst.msk [vmem:[#allocation2 + $0x18] sm:$0xff] %vm31_vm1, %v1076_v29 }
   0x5   :  { %985 = vmatprep.mubr.bf16.mxu0 %v52_v6  ;;  %v293_v13 = vld [vmem:[%s1316_s3 + $0x20] sm:$0xff]  ;;  %v294_v14 = vld [vmem:[%s1316_s3 + $0x28] sm:$0xff]  ;;  %v296_v20 = vld [vmem:[%s1316_s3 + $0x38] sm:$0xff]  ;;  %36 = vst.msk [vmem:[#allocation2 + $0x20] sm:$0xff] %vm31_vm1, %v1076_v29 }
   0x6   :  { %v426_v15 = vld [vmem:[%s1317_s5] sm:$0xf]  ;;  %v1068_v21 = vld [vmem:[%s1319_s2 + $0x8] sm:$0xff]   ;;  %v1065_v23 = vld [vmem:[%s1314_s1 + $0x30] sm:$0xff]   ;;  %37 = vst.msk [vmem:[#allocation2 + $0x28] sm:$0xff] %vm31_vm1, %v1076_v29 }
   0x7   :  { %972 = vmatpush3.bf16.msra.mxu0 %v1060_v2  ;;  %322 = vperm.xlu1 %1058, %v292_v10   ;;  %v493_v16 = vsel %vm491_vm0, %v426_v15, 0  ;;  %v409_v17 = vld [vmem:[%s1318_s4] sm:$0xf]  ;;  %v1069_v24 = vld [vmem:[%s1319_s2 + $0x10] sm:$0xff]   ;;  %v298_v26 = vld [vmem:[%s1316_s3 + $0x48] sm:$0xff]  ;;  %38 = vst.msk [vmem:[#allocation2 + $0x30] sm:$0xff] %vm31_vm1, %v1076_v29 }
   0x8   :  { %973 = vmatprep.subr.bf16.mxu0 %v1061_v3  ;;  %312 = vperm.xlu0 %1057, %v290_v9   ;;  %v1067_v18 = vld [vmem:[%s1319_s2] sm:$0xff]   ;;  %v617_v22 = vsel %vm491_vm0, %v409_v17, 0  ;;  %v1070_v27 = vld [vmem:[%s1319_s2 + $0x18] sm:$0xff]   ;;  %39 = vst.msk [vmem:[#allocation2 + $0x38] sm:$0xff] %vm31_vm1, %v1076_v29  ;;  %40 = vst.msk [vmem:[#allocation2 + $0x40] sm:$0xff] %vm31_vm1, %v1076_v29 }
   0x9   :  { %1053 = vmatprep.subr.msk.bf16.mxu1 %vm491_vm0, %v426_v15  ;;  %1003 = vmatprep.mubr.msk.bf16.mxu1 %vm31_vm1, %v1067_v18  ;;  %v297_v25 = vld [vmem:[%s1316_s3 + $0x40] sm:$0xff]  ;;  %v1066_v28 = vld [vmem:[%s1314_s1 + $0x38] sm:$0xff]   ;;  %41 = vst.msk [vmem:[#allocation2 + $0x48] sm:$0xff] %vm31_vm1, %v1076_v29  ;;  %42 = vst.msk [vmem:[#allocation2 + $0x50] sm:$0xff] %vm31_vm1, %v1076_v29 }
   0xa   :  { %1002 = vmatpush3.bf16.msra.mxu1 %v493_v16  ;;  %43 = vst.msk [vmem:[#allocation2 + $0x58] sm:$0xff] %vm31_vm1, %v1076_v29  ;;  %44 = vst.msk [vmem:[#allocation2 + $0x60] sm:$0xff] %vm31_vm1, %v1076_v29  ;;  %v299_v30 = vld [vmem:[%s1316_s3 + $0x50] sm:$0xff]  ;;  %v300_v31 = vld [vmem:[%s1316_s3 + $0x58] sm:$0xff] }
   0xb   :  { %974 = vmatpush3.bf16.msra.mxu0 %v1061_v3  ;;  %1054 = vmatprep.subr.msk.bf16.mxu1 %vm491_vm0, %v409_v17  ;;  %45 = vst.msk [vmem:[#allocation2 + $0x68] sm:$0xff] %vm31_vm1, %v1076_v29  ;;  %46 = vst.msk [vmem:[#allocation2 + $0x70] sm:$0xff] %vm31_vm1, %v1076_v29  ;;  %v49_v32 = vld [vmem:[%s1315_s0 + $0x8] sm:$0xff]  ;;  %v301_v35 = vld [vmem:[%s1316_s3 + $0x60] sm:$0xff] }
   0xc   :  { %975 = vmatprep.subr.bf16.mxu0 %v1062_v4  ;;  %327 = vperm.xlu0 %1057, %v293_v13   ;;  %47 = vst.msk [vmem:[#allocation2 + $0x78] sm:$0xff] %vm31_vm1, %v1076_v29  ;;  %v54_v34 = vunpack.c.l.s8.bf16 %v49_v32  ;;  %v302_v36 = vld [vmem:[%s1316_s3 + $0x68] sm:$0xff]  ;;  %v303_v37 = vld [vmem:[%s1316_s3 + $0x70] sm:$0xff]  ;;  %v304_v39 = vld [vmem:[%s1316_s3 + $0x78] sm:$0xff]  ;;  %v55_v40 = vunpack.c.h.s8.bf16 %v49_v32 }
   0xd   :  { %332 = vperm.xlu1 %1058, %v294_v14   ;;  %1004 = vmatmul.mubr.msk.bf16.vlgmr.msra.gmra.mrb[0].mxu1 %vm31_vm1, %v1068_v21  ;;  %v50_v38 = vld [vmem:[%s1315_s0 + $0x10] sm:$0xff]  ;;  %v51_v42 = vld [vmem:[%s1315_s0 + $0x18] sm:$0xff]  ;;  %v1071_v46 = vld [vmem:[%s1319_s2 + $0x20] sm:$0xff]  }
   0xe   :  { %1020 = vmatpush3.bf16.msra.mxu1 %v617_v22  ;;  %1007 = vmatprep.mubr.msk.bf16.mxu1 %vm31_vm1, %v1069_v24  ;;  %v56_v41 = vunpack.c.l.s8.bf16 %v50_v38  ;;  %v57_v43 = vunpack.c.h.s8.bf16 %v50_v38  ;;  %v58_v44 = vunpack.c.l.s8.bf16 %v51_v42  ;;  %v59_v45 = vunpack.c.h.s8.bf16 %v51_v42  ;;  %v1072_v47 = vld [vmem:[%s1319_s2 + $0x28] sm:$0xff]   ;;  %v1073_v48 = vld [vmem:[%s1319_s2 + $0x30] sm:$0xff]   ;;  %v1074_v49 = vld [vmem:[%s1319_s2 + $0x38] sm:$0xff]  }
   0xf   :  { %976 = vmatpush3.bf16.msra.mxu0 %v1062_v4  ;;  %v62_v52 = vld [vmem:[#allocation2 + $0x10] sm:$0xff]  ;;  %v60_v53 = vld [vmem:[#allocation2] sm:$0xff]  ;;  %v63_v56 = vld [vmem:[#allocation2 + $0x18] sm:$0xff] }
  0x10   :  { %977 = vmatprep.subr.bf16.mxu0 %v1063_v11  ;;  %337 = vperm.xlu0 %1057, %v295_v19   ;;  %v61_v59 = vld [vmem:[#allocation2 + $0x8] sm:$0xff]  ;;  %v66_v3 = vld [vmem:[#allocation2 + $0x30] sm:$0xff]  ;;  %v64_v4 = vld [vmem:[#allocation2 + $0x20] sm:$0xff] }
  0x11   :  { %342 = vperm.xlu1 %1058, %v296_v20   ;;  %v67_v7 = vld [vmem:[#allocation2 + $0x38] sm:$0xff]  ;;  %v65_v10 = vld [vmem:[#allocation2 + $0x28] sm:$0xff] }
  0x12   :  { %v71_v29 = vld [vmem:[#allocation2 + $0x58] sm:$0xff] }
  0x13   :  { %978 = vmatpush3.bf16.msra.mxu0 %v1063_v11 }
  0x14   :  { %979 = vmatprep.subr.bf16.mxu0 %v1064_v12  ;;  %347 = vperm.xlu0 %1057, %v297_v25  }
  0x15   :  { %352 = vperm.xlu1 %1058, %v298_v26   ;;  %1008 = vmatmul.mubr.msk.bf16.gmra.mrb[4].mxu1 %vm31_vm1, %v1070_v27  ;;  %v68_v26 = vld [vmem:[#allocation2 + $0x40] sm:$0xff] }
  0x16   :  { %1011 = vmatprep.mubr.msk.bf16.mxu1 %vm31_vm1, %v1071_v46 }
  0x17   :  { %980 = vmatpush3.bf16.msra.mxu0 %v1064_v12 }
  0x18   :  { %981 = vmatprep.subr.bf16.mxu0 %v1065_v23  ;;  %357 = vperm.xlu0 %1057, %v299_v30  }
  0x19   :  { %362 = vperm.xlu1 %1058, %v300_v31  }
  0x1b   :  { %982 = vmatpush3.bf16.msra.mxu0 %v1065_v23  ;;  %v70_v23 = vld [vmem:[#allocation2 + $0x50] sm:$0xff] }
  0x1c   :  { %983 = vmatprep.subr.bf16.mxu0 %v1066_v28  ;;  %367 = vperm.xlu0 %1057, %v301_v35  }
  0x1d   :  { %372 = vperm.xlu1 %1058, %v302_v36   ;;  %1012 = vmatmul.mubr.msk.bf16.gmra.mrb[8].mxu1 %vm31_vm1, %v1072_v47  ;;  %v74_v47 = vld [vmem:[#allocation2 + $0x70] sm:$0xff] }
  0x1e   :  { %1015 = vmatprep.mubr.msk.bf16.mxu1 %vm31_vm1, %v1073_v48 }
  0x1f   :  { %984 = vmatpush3.bf16.msra.mxu0 %v1066_v28 }
  0x20   :  { %377 = vperm.xlu0 %1057, %v303_v37  }
  0x21   :  { %382 = vperm.xlu1 %1058, %v304_v39  }
  0x22   :  { %986 = vmatmul.mubr.bf16.vlgmr.msra.gmra.mrb[0].mxu0 %v53_v33  ;;  %v69_v33 = vld [vmem:[#allocation2 + $0x48] sm:$0xff] }
  0x23   :  { %989 = vmatprep.mubr.bf16.mxu0 %v54_v34 }
  0x25   :  { %1016 = vmatmul.mubr.msk.bf16.gmra.mrb[12].mxu1 %vm31_vm1, %v1074_v49 }
  0x2a   :  { %990 = vmatmul.mubr.bf16.gmra.mrb[4].mxu0 %v55_v40 }
  0x2b   :  { %993 = vmatprep.mubr.bf16.mxu0 %v56_v41 }
  0x32   :  { %994 = vmatmul.mubr.bf16.gmra.mrb[8].mxu0 %v57_v43 }
  0x33   :  { %997 = vmatprep.mubr.bf16.mxu0 %v58_v44 }
  0x3a   :  { %998 = vmatmul.mubr.bf16.gmra.mrb[12].mxu0 %v59_v45 }
  0x82   :  { %v318_v50 = vpop.permute.xlu1 %317 }
  0x83   :  { %v308_v51 = vpop.permute.xlu0 %307 }
  0x86   :  { %v323_v54 = vpop.permute.xlu1 %322 }
  0x87   :  { %v313_v60 = vpop.permute.xlu0 %312 }
  0x8b   :  { %v328_v5 = vpop.permute.xlu0 %327 }
  0x8c   :  { %v333_v2 = vpop.permute.xlu1 %332 }
  0x8f   :  { %v338_v22 = vpop.permute.xlu0 %337 }
  0x90   :  { %v343_v16 = vpop.permute.xlu1 %342 }
  0x93   :  { %v348_v41 = vpop.permute.xlu0 %347 }
  0x94   :  { %v353_v35 = vpop.permute.xlu1 %352 }
  0xf5   :  { %v987_v55 = vpop.f32.mrb[0].mxu0 }
  0xf6   :  { %v239_v57 = vadd.f32 %v987_v55, %v62_v52  ;;  %v174_v58 = vpop.f32.mrb[1].mxu0  ;;  %v363_v52 = vpop.permute.xlu1 %362 }
  0xf7   :  { %v237_v61 = vadd.f32 %v174_v58, %v60_v53  ;;  %v988_v62 = vpop.f32.mrb[2].mxu0  ;;  %v73_v58 = vld [vmem:[#allocation2 + $0x68] sm:$0xff] }
  0xf8   :  { %256 = vst.msk [vmem:[#allocation2 + $0x10] sm:$0xff] %vm31_vm1, %v239_v57  ;;  %v240_v63 = vadd.f32 %v988_v62, %v63_v56  ;;  %v177_v0 = vpop.f32.mrb[3].mxu0 }
  0xf9   :  { %254 = vst.msk [vmem:[#allocation2] sm:$0xff] %vm31_vm1, %v237_v61  ;;  %v238_v1 = vadd.f32 %v177_v0, %v61_v59 }
  0xfa   :  { %257 = vst.msk [vmem:[#allocation2 + $0x18] sm:$0xff] %vm31_vm1, %v240_v63 }
  0xfb   :  { %255 = vst.msk [vmem:[#allocation2 + $0x8] sm:$0xff] %vm31_vm1, %v238_v1 }
  0xfd   :  { %v991_v6 = vpop.f32.mrb[4].mxu0 }
  0xfe   :  { %v243_v8 = vadd.f32 %v991_v6, %v66_v3  ;;  %v190_v9 = vpop.f32.mrb[5].mxu0 }
  0xff   :  { %v241_v11 = vadd.f32 %v190_v9, %v64_v4  ;;  %v992_v12 = vpop.f32.mrb[6].mxu0  ;;  %v275_v18 = vld [vmem:[#allocation2 + $0x10] sm:$0xff] }
 0x100   :  { %260 = vst.msk [vmem:[#allocation2 + $0x30] sm:$0xff] %vm31_vm1, %v243_v8  ;;  %v244_v13 = vadd.f32 %v992_v12, %v67_v7  ;;  %v193_v14 = vpop.f32.mrb[7].mxu0  ;;  %v273_v15 = vld [vmem:[#allocation2] sm:$0xff]  ;;  %v387_v27 = vmul.f32 %v318_v50, %v275_v18  ;;  %v373_v7 = vpop.permute.xlu1 %372 }
 0x101   :  { %258 = vst.msk [vmem:[#allocation2 + $0x20] sm:$0xff] %vm31_vm1, %v241_v11  ;;  %v242_v17 = vadd.f32 %v193_v14, %v65_v10  ;;  %v276_v19 = vld [vmem:[#allocation2 + $0x18] sm:$0xff]  ;;  %v385_v24 = vmul.f32 %v308_v51, %v273_v15  ;;  %v72_v50 = vld [vmem:[#allocation2 + $0x60] sm:$0xff] }
 0x102   :  { %261 = vst.msk [vmem:[#allocation2 + $0x38] sm:$0xff] %vm31_vm1, %v244_v13  ;;  %v274_v20 = vld [vmem:[#allocation2 + $0x8] sm:$0xff]  ;;  %v388_v21 = vmul.f32 %v323_v54, %v276_v19  ;;  %v75_v54 = vld [vmem:[#allocation2 + $0x78] sm:$0xff] }
 0x103   :  { %259 = vst.msk [vmem:[#allocation2 + $0x28] sm:$0xff] %vm31_vm1, %v242_v17  ;;  %v386_v25 = vmul.f32 %v313_v60, %v274_v20  ;;  %v358_v60 = vpop.permute.xlu0 %357 }
 0x104   :  { %v402_v34 = vpack.c.bf16 %v388_v21, %v387_v27  ;;  %v383_v15 = vpop.permute.xlu1 %382  ;;  %v855_v27 = vld [vmem:[%s1320_s6] ss:$0 sm:$0xff] }
 0x105   :  { %v995_v28 = vpop.f32.mrb[8].mxu0  ;;  %v401_v30 = vpack.c.bf16 %v386_v25, %v385_v24 }
 0x106   :  { %v247_v31 = vadd.f32 %v995_v28, %v70_v23  ;;  %v206_v32 = vpop.f32.mrb[9].mxu0 }
 0x107   :  { %v245_v36 = vadd.f32 %v206_v32, %v68_v26  ;;  %v996_v37 = vpop.f32.mrb[10].mxu0  ;;  %1021 = vmatprep.mubr.msk.bf16.mxu1 %vm31_vm1, %v401_v30  ;;  %v279_v43 = vld [vmem:[#allocation2 + $0x30] sm:$0xff]  ;;  %v368_v11 = vpop.permute.xlu0 %367 }
 0x108   :  { %264 = vst.msk [vmem:[#allocation2 + $0x50] sm:$0xff] %vm31_vm1, %v247_v31  ;;  %v248_v38 = vadd.f32 %v996_v37, %v71_v29  ;;  %v209_v39 = vpop.f32.mrb[11].mxu0  ;;  %1022 = vmatmul.mubr.msk.bf16.vlgmr.msra.gmra.mrb[0].mxu1 %vm31_vm1, %v402_v34  ;;  %v277_v40 = vld [vmem:[#allocation2 + $0x20] sm:$0xff]  ;;  %v391_v51 = vmul.f32 %v338_v22, %v279_v43 }
 0x109   :  { %262 = vst.msk [vmem:[#allocation2 + $0x40] sm:$0xff] %vm31_vm1, %v245_v36  ;;  %v246_v42 = vadd.f32 %v209_v39, %v69_v33  ;;  %v280_v44 = vld [vmem:[#allocation2 + $0x38] sm:$0xff]  ;;  %v389_v48 = vmul.f32 %v328_v5, %v277_v40 }
 0x10a   :  { %265 = vst.msk [vmem:[#allocation2 + $0x58] sm:$0xff] %vm31_vm1, %v248_v38  ;;  %v278_v45 = vld [vmem:[#allocation2 + $0x28] sm:$0xff]  ;;  %v392_v46 = vmul.f32 %v343_v16, %v280_v44 }
 0x10b   :  { %263 = vst.msk [vmem:[#allocation2 + $0x48] sm:$0xff] %vm31_vm1, %v246_v42  ;;  %v390_v49 = vmul.f32 %v333_v2, %v278_v45  ;;  %v378_v20 = vpop.permute.xlu0 %377 }
 0x10c   :  { %v404_v59 = vpack.c.bf16 %v392_v46, %v391_v51 }
 0x10d   :  { %v999_v53 = vpop.f32.mrb[12].mxu0  ;;  %v403_v55 = vpack.c.bf16 %v390_v49, %v389_v48 }
 0x10e   :  { %v251_v56 = vadd.f32 %v999_v53, %v74_v47  ;;  %v222_v57 = vpop.f32.mrb[13].mxu0 }
 0x10f   :  { %v249_v61 = vadd.f32 %v222_v57, %v72_v50  ;;  %v1000_v62 = vpop.f32.mrb[14].mxu0  ;;  %1025 = vmatprep.mubr.msk.bf16.mxu1 %vm31_vm1, %v403_v55  ;;  %v283_v3 = vld [vmem:[#allocation2 + $0x50] sm:$0xff] }
 0x110   :  { %268 = vst.msk [vmem:[#allocation2 + $0x70] sm:$0xff] %vm31_vm1, %v251_v56  ;;  %v252_v63 = vadd.f32 %v1000_v62, %v75_v54  ;;  %v225_v0 = vpop.f32.mrb[15].mxu0  ;;  %1026 = vmatmul.mubr.msk.bf16.gmra.mrb[4].mxu1 %vm31_vm1, %v404_v59  ;;  %v281_v1 = vld [vmem:[#allocation2 + $0x40] sm:$0xff]  ;;  %v395_v10 = vmul.f32 %v358_v60, %v283_v3 }
 0x111   :  { %266 = vst.msk [vmem:[#allocation2 + $0x60] sm:$0xff] %vm31_vm1, %v249_v61  ;;  %v250_v2 = vadd.f32 %v225_v0, %v73_v58  ;;  %v284_v4 = vld [vmem:[#allocation2 + $0x58] sm:$0xff]  ;;  %v393_v8 = vmul.f32 %v348_v41, %v281_v1 }
 0x112   :  { %269 = vst.msk [vmem:[#allocation2 + $0x78] sm:$0xff] %vm31_vm1, %v252_v63  ;;  %v282_v5 = vld [vmem:[#allocation2 + $0x48] sm:$0xff]  ;;  %v396_v6 = vmul.f32 %v363_v52, %v284_v4 }
 0x113   :  { %267 = vst.msk [vmem:[#allocation2 + $0x68] sm:$0xff] %vm31_vm1, %v250_v2  ;;  %v394_v9 = vmul.f32 %v353_v35, %v282_v5 }
 0x114   :  { %v406_v13 = vpack.c.bf16 %v396_v6, %v395_v10 }
 0x115   :  { %v405_v12 = vpack.c.bf16 %v394_v9, %v393_v8 }
 0x117   :  { %1029 = vmatprep.mubr.msk.bf16.mxu1 %vm31_vm1, %v405_v12  ;;  %v287_v16 = vld [vmem:[#allocation2 + $0x70] sm:$0xff] }
 0x118   :  { %1030 = vmatmul.mubr.msk.bf16.gmra.mrb[8].mxu1 %vm31_vm1, %v406_v13  ;;  %v285_v14 = vld [vmem:[#allocation2 + $0x60] sm:$0xff]  ;;  %v399_v23 = vmul.f32 %v378_v20, %v287_v16 }
 0x119   :  { %v288_v17 = vld [vmem:[#allocation2 + $0x78] sm:$0xff]  ;;  %v397_v21 = vmul.f32 %v368_v11, %v285_v14 }
 0x11a   :  { %v286_v18 = vld [vmem:[#allocation2 + $0x68] sm:$0xff]  ;;  %v400_v19 = vmul.f32 %v383_v15, %v288_v17 }
 0x11b   :  { %v398_v22 = vmul.f32 %v373_v7, %v286_v18 }
 0x11c   :  { %v408_v25 = vpack.c.bf16 %v400_v19, %v399_v23 }
 0x11d   :  { %v407_v24 = vpack.c.bf16 %v398_v22, %v397_v21 }
 0x11f   :  { %1033 = vmatprep.mubr.msk.bf16.mxu1 %vm31_vm1, %v407_v24 }
 0x120   :  { %1034 = vmatmul.mubr.msk.bf16.gmra.mrb[12].mxu1 %vm31_vm1, %v408_v25 }
 0x1db   :  { %v1023_v26 = vpop.f32.mrb[0].mxu1 }
 0x1dc   :  { %v653_v28 = vpop.f32.mrb[1].mxu1  ;;  %v725_v30 = vadd.f32 %v1023_v26, %v855_v27 }
 0x1dd   :  { %v1024_v29 = vpop.f32.mrb[2].mxu1  ;;  %v723_v33 = vadd.f32 %v855_v27, %v653_v28 }
 0x1de   :  { %v726_v31 = vadd.f32 %v1024_v29, %v855_v27  ;;  %v656_v32 = vpop.f32.mrb[3].mxu1 }
 0x1df   :  { %v724_v34 = vadd.f32 %v855_v27, %v656_v32 }
 0x1e0   :  { %v896_v35 = vpack.c.bf16 %v726_v31, %v725_v30 }
 0x1e1   :  { %v891_v36 = vpack.c.bf16 %v724_v34, %v723_v33 }
 0x1e2   :  { %928 = vst [vmem:[%s1321_s7 + $0x8] sm:$0xff] %v896_v35  }
 0x1e3   :  { %892 = vst [vmem:[%s1321_s7] sm:$0xff] %v891_v36   ;;  %v1027_v37 = vpop.f32.mrb[4].mxu1 }
 0x1e4   :  { %v669_v38 = vpop.f32.mrb[5].mxu1  ;;  %v729_v40 = vadd.f32 %v1027_v37, %v855_v27 }
 0x1e5   :  { %v1028_v39 = vpop.f32.mrb[6].mxu1  ;;  %v727_v43 = vadd.f32 %v855_v27, %v669_v38 }
 0x1e6   :  { %v730_v41 = vadd.f32 %v1028_v39, %v855_v27  ;;  %v672_v42 = vpop.f32.mrb[7].mxu1 }
 0x1e7   :  { %v728_v44 = vadd.f32 %v855_v27, %v672_v42 }
 0x1e8   :  { %v906_v45 = vpack.c.bf16 %v730_v41, %v729_v40 }
 0x1e9   :  { %v901_v46 = vpack.c.bf16 %v728_v44, %v727_v43 }
 0x1ea   :  { %930 = vst [vmem:[%s1321_s7 + $0x18] sm:$0xff] %v906_v45  }
 0x1eb   :  { %929 = vst [vmem:[%s1321_s7 + $0x10] sm:$0xff] %v901_v46   ;;  %v1031_v47 = vpop.f32.mrb[8].mxu1 }
 0x1ec   :  { %v685_v48 = vpop.f32.mrb[9].mxu1  ;;  %v733_v50 = vadd.f32 %v1031_v47, %v855_v27 }
 0x1ed   :  { %v1032_v49 = vpop.f32.mrb[10].mxu1  ;;  %v731_v53 = vadd.f32 %v855_v27, %v685_v48 }
 0x1ee   :  { %v734_v51 = vadd.f32 %v1032_v49, %v855_v27  ;;  %v688_v52 = vpop.f32.mrb[11].mxu1 }
 0x1ef   :  { %v732_v54 = vadd.f32 %v855_v27, %v688_v52 }
 0x1f0   :  { %v916_v55 = vpack.c.bf16 %v734_v51, %v733_v50 }
 0x1f1   :  { %v911_v56 = vpack.c.bf16 %v732_v54, %v731_v53 }
 0x1f2   :  { %932 = vst [vmem:[%s1321_s7 + $0x28] sm:$0xff] %v916_v55  }
 0x1f3   :  { %931 = vst [vmem:[%s1321_s7 + $0x20] sm:$0xff] %v911_v56   ;;  %v1035_v57 = vpop.f32.mrb[12].mxu1 }
 0x1f4   :  { %v701_v58 = vpop.f32.mrb[13].mxu1  ;;  %v737_v60 = vadd.f32 %v1035_v57, %v855_v27 }
 0x1f5   :  { %v1036_v59 = vpop.f32.mrb[14].mxu1  ;;  %v735_v63 = vadd.f32 %v855_v27, %v701_v58 }
 0x1f6   :  { %v738_v61 = vadd.f32 %v1036_v59, %v855_v27  ;;  %v704_v62 = vpop.f32.mrb[15].mxu1 }
 0x1f7   :  { %v736_v0 = vadd.f32 %v855_v27, %v704_v62 }
 0x1f8   :  { %v926_v1 = vpack.c.bf16 %v738_v61, %v737_v60 }
 0x1f9   :  { %v921_v2 = vpack.c.bf16 %v736_v0, %v735_v63 }
 0x1fa   :  { %934 = vst [vmem:[%s1321_s7 + $0x38] sm:$0xff] %v926_v1  }
 0x1fb   :  { %933 = vst [vmem:[%s1321_s7 + $0x30] sm:$0xff] %v921_v2  }

</bundles_post_ra>
